<compile_context>
chip_gen: v6e
topology: v6e:2x2x1
jax: 0.10.0
libtpu: 0.0.40
codegen_flags: <defaults>
</compile_context>

<pallas_src>
import jax
import jax.numpy as jnp
from jax.experimental import pallas as pl
from jax.experimental.pallas import tpu as pltpu


def _make_pe(d_model: int, max_len: int, dtype=jnp.float32) -> jnp.ndarray:
    """Sinusoidal positional-encoding table, shape (1, max_len, d_model)."""
    position = jnp.arange(0, max_len, dtype=jnp.float32)[:, None]            # (max_len, 1)
    div = jnp.exp(jnp.arange(0, d_model, 2, dtype=jnp.float32)
                  * (-jnp.log(10000.0) / d_model))                           # (d_model//2,)
    ang = position * div                                                      # (max_len, d_model//2)
    pe = jnp.zeros((max_len, d_model), dtype=jnp.float32)
    pe = pe.at[:, 0::2].set(jnp.sin(ang))
    pe = pe.at[:, 1::2].set(jnp.cos(ang))
    return pe[None, :, :].astype(dtype)                                       # (1, max_len, d_model)


def _add_pe_kernel(x_ref, pe_ref, o_ref):
    # Pure elementwise broadcast add (pe block has a leading 1 that broadcasts
    # over the batch-widened x block).
    o_ref[...] = (x_ref[...] + pe_ref[...].astype(x_ref.dtype)).astype(o_ref.dtype)


_TARGET_BLOCK_BYTES = 4 * 1024 * 1024    # ~4 MiB per x/out tile
_VMEM_LIMIT_BYTES = 32 * 1024 * 1024     # 3 arrays x 2 buffers x 4 MiB = 24 MiB + headroom


def positional_encoding_forward(x: jnp.ndarray, pe: jnp.ndarray) -> jnp.ndarray:
    """x: (B, S, D), pe: (1, max_len, D)  ->  (B, S, D) with out = x + pe[:, :S]."""
    B, S, D = x.shape
    assert pe.ndim == 3 and pe.shape[0] == 1 and pe.shape[2] == D
    assert S <= pe.shape[1], "sequence length exceeds positional-encoding table"

    # NOTE: ideally pe is precomputed in x.dtype at module init (as done in
    # __main__) so this cast never materializes an extra HBM round-trip.
    if pe.dtype != x.dtype:
        pe = pe.astype(x.dtype)

    itemsize = jnp.dtype(x.dtype).itemsize
    pack = max(8, 32 // itemsize)          # sublane packing: f32 -> 8, bf16 -> 16, int8/fp8 -> 32
    target = _TARGET_BLOCK_BYTES
    cparams = pltpu.CompilerParams(
        dimension_semantics=None,          # filled per-path below
        vmem_limit_bytes=_VMEM_LIMIT_BYTES,
    )

    if D % 128 == 0:
        # ---------------- lane-dense 3-D path ----------------
        row_bytes = D * itemsize
        if pack * row_bytes > target:
            # Huge d_model: also tile D (multiples of 128 keep lanes dense).
            ts = pack if S > pack else S
            td = min(D, max(128, (target // (ts * itemsize)) // 128 * 128))
            tb = 1
        else:
            td = D
            max_rows = max(pack, (target // row_bytes) // pack * pack)
            if S >= max_rows:
                ts, tb = max_rows, 1
            else:
                # Per-batch slab is small: widen the block over the batch axis
                # so each grid step still moves ~target bytes.
                ts = S
                tb = min(B, max(1, target // (S * row_bytes)))

        grid = (pl.cdiv(S, ts), pl.cdiv(D, td), pl.cdiv(B, tb))   # batch innermost -> pe reuse
        return pl.pallas_call(
            _add_pe_kernel,
            out_shape=jax.ShapeDtypeStruct((B, S, D), x.dtype),
            grid_spec=pltpu.PrefetchScalarGridSpec(
                num_scalar_prefetch=0,
                grid=grid,
                in_specs=[
                    pl.BlockSpec((tb, ts, td), lambda s, d, b: (b, s, d)),   # x tile
                    # pe index independent of b => DMA'd once per (s, d) tile,
                    # reused across all batch-tile inner steps.
                    pl.BlockSpec((1, ts, td), lambda s, d, b: (0, s, d)),
                ],
                out_specs=pl.BlockSpec((tb, ts, td), lambda s, d, b: (b, s, d)),
            ),
            compiler_params=pltpu.CompilerParams(
                dimension_semantics=("parallel", "parallel", "parallel"),
                vmem_limit_bytes=_VMEM_LIMIT_BYTES,
            ),
        )(x, pe)

    # ---------------- flattened path (D not a multiple of 128) ----------------
    cols = S * D
    x2 = x.reshape(B, cols)
    # Tiny one-time (S, D) slice+reshape of the table; hoistable to module init
    # if the call shape is static.
    pe2 = pe[:, :S, :].reshape(1, cols)

    # Size (tb, tc) JOINTLY so tb * tc * itemsize ~= target (previous version
    # ignored tb and could request a huge VMEM block).
    if cols * itemsize * pack <= target:
        # A full flattened row is cheap: keep rows whole, widen over batch.
        tc = cols
        max_tb = (target // (cols * itemsize)) // pack * pack     # >= pack here
        tb = B if B <= max_tb else max_tb
    else:
        tb = B if B <= pack else pack
        tc = max(128, (target // (tb * itemsize)) // 128 * 128)
        tc = min(tc, cols)

    grid = (pl.cdiv(cols, tc), pl.cdiv(B, tb))                    # batch tiles innermost

    out2 = pl.pallas_call(
        _add_pe_kernel,
        out_shape=jax.ShapeDtypeStruct((B, cols), x.dtype),
        grid_spec=pltpu.PrefetchScalarGridSpec(
            num_scalar_prefetch=0,
            grid=grid,
            in_specs=[
                pl.BlockSpec((tb, tc), lambda c, r: (r, c)),      # x tile
                pl.BlockSpec((1, tc), lambda c, r: (0, c)),       # pe row tile, reused over r
            ],
            out_specs=pl.BlockSpec((tb, tc), lambda c, r: (r, c)),
        ),
        compiler_params=pltpu.CompilerParams(
            dimension_semantics=("parallel", "parallel"),
            vmem_limit_bytes=_VMEM_LIMIT_BYTES,
        ),
    )(x2, pe2)
    return out2.reshape(B, S, D)


if __name__ == "__main__":
    root = jax.random.PRNGKey(0)
    k1, k2, k3 = jax.random.split(root, 3)

    # Case 1: module-like demo shapes, small d_model (<128) -> flattened lane-dense path.
    B, S, D, MAX_LEN = 2, 8, 32, 100
    x = jax.random.normal(k1, (B, S, D), dtype=jnp.float32)
    pe = _make_pe(d_model=D, max_len=MAX_LEN)                     # fp32, precomputed once
    out = jax.block_until_ready(positional_encoding_forward(x, pe))
    ref = x + pe[:, :S, :]
    assert out.shape == (B, S, D)
    assert jnp.allclose(out, ref, atol=1e-6), "mismatch vs reference (flattened path)"

    # Case 2: d_model multiple of 128 -> 3-D path (batch-widened block, pe reuse).
    B2, S2, D2, MAX_LEN2 = 2, 16, 128, 64
    x2 = jax.random.normal(k2, (B2, S2, D2), dtype=jnp.float32)
    pe2 = _make_pe(d_model=D2, max_len=MAX_LEN2)
    out2 = jax.block_until_ready(positional_encoding_forward(x2, pe2))
    ref2 = x2 + pe2[:, :S2, :]
    assert out2.shape == (B2, S2, D2)
    assert jnp.allclose(out2, ref2, atol=1e-6), "mismatch vs reference (3D path)"

    # Case 3: bf16 activations (exercises the 16-row sublane packing and the
    # precomputed-in-x.dtype pe table).  NOTE: pe is applied in bf16 (output
    # dtype = x.dtype), ~1 bf16 ulp different from a fp32-promoted add.
    B3, S3, D3, MAX_LEN3 = 4, 8, 128, 32
    x3 = jax.random.normal(k3, (B3, S3, D3), dtype=jnp.float32).astype(jnp.bfloat16)
    pe3 = _make_pe(d_model=D3, max_len=MAX_LEN3, dtype=jnp.bfloat16)
    out3 = jax.block_until_ready(positional_encoding_forward(x3, pe3))
    ref3 = x3 + pe3[:, :S3, :]
    assert out3.shape == (B3, S3, D3)
    assert jnp.allclose(out3.astype(jnp.float32), ref3.astype(jnp.float32), atol=1e-2), \
        "mismatch vs reference (bf16 path)"

    print("KERNEL_OK")
</pallas_src>

<mosaic_0001>
module attributes {stable_mosaic.version = 11 : i64} {
  func.func @_add_pe_kernel(%arg0: i32, %arg1: i32, %arg2: memref<2x256xf32, #tpu.memory_space<vmem>>, %arg3: memref<1x256xf32, #tpu.memory_space<vmem>>, %arg4: memref<2x256xf32, #tpu.memory_space<vmem>>) attributes {dimension_semantics = [#tpu.dimension_semantics<parallel>, #tpu.dimension_semantics<parallel>], iteration_bounds = array<i64: 1, 1>, scalar_prefetch = 0 : i64, scratch_operands = 0 : i64, tpu.core_type = #tpu.core_type<tc>, window_params = [{transform_indices = @transform_0, window_bounds = array<i64: 2, 256>}, {transform_indices = @transform_1, window_bounds = array<i64: 1, 256>}, {transform_indices = @transform_2, window_bounds = array<i64: 2, 256>}]} {
    %c0 = arith.constant 0 : index
    %c0_0 = arith.constant 0 : index
    %0 = vector.load %arg2[%c0, %c0_0] : memref<2x256xf32, #tpu.memory_space<vmem>>, vector<2x256xf32>
    %c0_1 = arith.constant 0 : index
    %c0_2 = arith.constant 0 : index
    %1 = vector.load %arg3[%c0_1, %c0_2] : memref<1x256xf32, #tpu.memory_space<vmem>>, vector<1x256xf32>
    %2 = vector.broadcast %1 : vector<1x256xf32> to vector<2x256xf32>
    %3 = arith.addf %0, %2 : vector<2x256xf32>
    %c0_3 = arith.constant 0 : index
    %c0_4 = arith.constant 0 : index
    %4 = vector.load %arg4[%c0_3, %c0_4] : memref<2x256xf32, #tpu.memory_space<vmem>>, vector<2x256xf32>
    tpu.vector_store %arg4[%c0_3, %c0_4], %3 {strides = array<i32>} : memref<2x256xf32, #tpu.memory_space<vmem>>, vector<2x256xf32>,
    return
  }
  func.func @transform_0(%arg0: i32, %arg1: i32) -> (i32, i32) {
    %c0_i32 = arith.constant 0 : i32
    return %arg1, %arg0 : i32, i32
  }
  func.func @transform_1(%arg0: i32, %arg1: i32) -> (i32, i32) {
    %c0_i32 = arith.constant 0 : i32
    %c0_i32_0 = arith.constant 0 : i32
    return %c0_i32, %arg0 : i32, i32
  }
  func.func @transform_2(%arg0: i32, %arg1: i32) -> (i32, i32) {
    %c0_i32 = arith.constant 0 : i32
    return %arg1, %arg0 : i32, i32
  }
}

</mosaic_0001>

<bundles_post_ra>
// kernel: tpu_custom_call.1
= control target key start
LH: loop header
LB: loop body
LE: loop exit
PB: predicated region body
PF: predicated region fallthrough
CT: control target
= control target key end

     0   :  { %7 = vsyncpa [#allocation3], 0  ;;  %s172_s0 = inlined_call_operand.hbm [shape: f32[2,256], index: 0, kind: input, shape index: {}]   ;;  %s173_s1 = inlined_call_operand.hbm [shape: f32[1,256], index: 1, kind: input, shape index: {}]   ;;  %s174_s2 = inlined_call_operand.hbm [shape: f32[2,256], index: 2, kind: output, shape index: {}]  }
   0x1   :  { %8 = vsyncpa [#allocation6], 0 }
   0x2   :  { %9 = vsyncpa [#allocation4], 0  ;;  %s144_s9 = smov [#allocation2]   ;;  %s145_s11 = smov [#allocation5]  }
   0x3   :  { %s16_s10 = sshll.u32 %s144_s9, 4  ;;  %s26_s12 = sshll.u32 %s145_s11, 4  ;;  %s17_s10 = int_to_ptr.vmem [resolvable:$true] %s16_s10  ;;  %s27_s12 = int_to_ptr.vmem [resolvable:$true] %s26_s12 }
   0x4   :  { %s86_s13 = scalar_lea.vmem %s17_s10, 64  ;;  %p91_p1 = scmp.lt.s32.totalorder %s17_s10, %s17_s10 }
   0x5   :  { %p87_p0 = scmp.ne.s32.totalorder %s17_s10, %s86_s13  ;;  %p92_p2 = scmp.lt.s32.totalorder %s86_s13, %s86_s13 }
   0x7   :  { %p93_p3 = por %p92_p2, %p91_p1 }
   0x9   :  { %p94_p4 = pnand %p93_p3, %p87_p0 }
   0xb   :  { %97 = shalt.err (!%p94_p4)
}
   0xc   :  { %19 = dma.hbm_to_vmem [thread:$0]  %s172_s0, 64, %s17_s10, [#allocation3]  }
   0xd   :  { %s106_s16 = scalar_lea.vmem %s27_s12, 32  ;;  %p111_p6 = scmp.lt.s32.totalorder %s27_s12, %s27_s12 }
   0xe   :  { %p107_p5 = scmp.ne.s32.totalorder %s27_s12, %s106_s16  ;;  %p112_p7 = scmp.lt.s32.totalorder %s106_s16, %s106_s16 }
  0x10   :  { %p113_p8 = por %p112_p7, %p111_p6 }
  0x12   :  { %p114_p9 = pnand %p113_p8, %p107_p5 }
  0x14   :  { %117 = shalt.err (!%p114_p9)
}
  0x15   :  { %29 = dma.hbm_to_vmem [thread:$0]  %s173_s1, 32, %s27_s12, [#allocation6]  }
  0x16   :  { %138 = dma.done.wait [#allocation3], 64  }
  0x17   :  { %139 = vsyncadd [#allocation3], 4294967232 }
  0x18   :  { %140 = dma.done.wait [#allocation6], 32  }
  0x19   :  { %141 = vsyncadd [#allocation6], 4294967264  ;;  %v39_v0 = vlaneseq  ;;  %v146_v1 = vmov 1983009808   ;;  %v37_v7 = vld [vmem:[#allocation5] sm:$0x3] }
  0x1a   :  { %v49_v2 = vunpack.c.l.s4 %v146_v1  ;;  %v36_v12 = vld [vmem:[#allocation2] sm:$0xf]  ;;  %s147_s0 = smov [#allocation7]  }
  0x1b   :  { %v40_v3 = vshrl.u32 %v39_v0, 7  ;;  %s64_s19 = sshll.u32 %s147_s0, 4  ;;  %s65_s19 = int_to_ptr.vmem [resolvable:$true] %s64_s19 }
  0x1c   :  { %v50_v6 = vunpack.c.0.s8 %v49_v2  ;;  %s118_s1 = scalar_lea.vmem %s65_s19, 64  ;;  %p123_p11 = scmp.lt.s32.totalorder %s65_s19, %s65_s19 }
  0x1d   :  { %v41_v4 = vsub.s32 0, %v40_v3  ;;  %v45_v5 = vsub.s32 1, %v40_v3  ;;  %p119_p10 = scmp.ne.s32.totalorder %s65_s19, %s118_s1  ;;  %p124_p12 = scmp.lt.s32.totalorder %s118_s1, %s118_s1 }
  0x1e   :  { %v53_v10 = vsub.s32 %v50_v6, %v40_v3 }
  0x1f   :  { %v42_v8 = vrot.slane %v37_v7, %v41_v4  ;;  %v46_v9 = vrot.slane %v37_v7, %v45_v5  ;;  %p125_p13 = por %p124_p12, %p123_p11 }
  0x21   :  { %v47_v11 = vcombine.low %v42_v8, %v46_v9  ;;  %p126_p0 = pnand %p125_p13, %p119_p10 }
  0x23   :  { %v54_v13 = vrot.slane %v47_v11, %v53_v10 }
  0x25   :  { %v56_v14 = vadd.f32 %v54_v13, %v36_v12 }
  0x27   :  { %57 = vst [vmem:[#allocation7] sm:$0xf] %v56_v14 }
  0x28   :  { %129 = shalt.err (!%p126_p0)
}
  0x29   :  { %67 = dma.vmem_to_hbm [thread:$0]  %s65_s19, 64, %s174_s2, [#allocation4]  }
  0x2a   :  { %142 = dma.done.wait [#allocation4], 64  }
  0x2b   :  { %143 = vsyncadd [#allocation4], 4294967232 }
  0x2c   :  { %71 = vsyncpa [#allocation3], 1 }
  0x2d   :  { %72 = vsyncpa [#allocation6], 1 }
  0x2e   :  { %73 = vsyncpa [#allocation4], 1 }

</bundles_post_ra>
